<compile_context>
chip_gen: v5e
topology: v5e:2x2
jax: 0.10.0
libtpu: 0.0.40
codegen_flags: <defaults>
</compile_context>

<pallas_src>
import jax
import jax.numpy as jnp
from jax.experimental import pallas as pl
from jax.experimental.pallas import tpu as pltpu

_LANE = 128
_MAX_TB = 32768   # 2 x 32768 x 4B = 256 KiB input block; double-buffered, fits VMEM easily


def mlp_kernel(params_ref, xT_ref, o_ref):
    """params_ref: SMEM (13,) f32 = [w1 (2x3 row-major), b1 (3), w2 (3), b2 (1)].
    xT_ref: VMEM (2, TB)  -- features on sublanes, batch on lanes.
    o_ref : VMEM (1, TB)  -- lane-dense output slab.
    """
    x0 = xT_ref[0:1, :]          # (1, TB)
    x1 = xT_ref[1:2, :]          # (1, TB)

    # fc1 + sigmoid: h_j = sigmoid(x0*w1[0,j] + x1*w1[1,j] + b1[j])  (pure VPU MACs)
    h0 = jax.nn.sigmoid(x0 * params_ref[0] + x1 * params_ref[3] + params_ref[6])
    h1 = jax.nn.sigmoid(x0 * params_ref[1] + x1 * params_ref[4] + params_ref[7])
    h2 = jax.nn.sigmoid(x0 * params_ref[2] + x1 * params_ref[5] + params_ref[8])

    # fc2 + sigmoid
    o = jax.nn.sigmoid(h0 * params_ref[9] + h1 * params_ref[10]
                       + h2 * params_ref[11] + params_ref[12])
    o_ref[...] = o.astype(o_ref.dtype)


def mlp_forward(x, w1, b1, w2, b2):
    """x: (B, 2); w1: (2, 3); b1: (1, 3); w2: (3, 1); b2: (1, 1) -> (B, 1)."""
    B = x.shape[0]
    out_dtype = x.dtype

    # Batch tile along the lane axis.
    b_lane = ((B + _LANE - 1) // _LANE) * _LANE
    tb = min(_MAX_TB, b_lane)
    bp = ((B + tb - 1) // tb) * tb
    num_blocks = bp // tb

    # (B, 2) -> (2, Bp): features on sublanes, batch on lanes (zero-pad tail).
    xT = jnp.pad(x.astype(jnp.float32).T, ((0, 0), (0, bp - B)))

    # Pack all 13 parameter scalars for SMEM.
    params = jnp.concatenate([
        w1.reshape(-1), b1.reshape(-1), w2.reshape(-1), b2.reshape(-1)
    ]).astype(jnp.float32)

    out_slab = pl.pallas_call(
        mlp_kernel,
        out_shape=jax.ShapeDtypeStruct((1, bp), jnp.float32),
        grid=(num_blocks,),
        in_specs=[
            pl.BlockSpec(memory_space=pltpu.MemorySpace.SMEM),   # weights / biases
            pl.BlockSpec((2, tb), lambda i: (0, i)),             # xT batch tile
        ],
        out_specs=pl.BlockSpec((1, tb), lambda i: (0, i)),
        compiler_params=pltpu.CompilerParams(
            dimension_semantics=("parallel",)),
    )(params, xT)

    return out_slab[0, :B].reshape(B, 1).astype(out_dtype)


def init_params(key):
    """Deterministic init matching PyTorch nn.Linear shapes.

    PyTorch stores weight as (out, in); we store the transpose (in, out).
    Init: uniform(-1/sqrt(fan_in), 1/sqrt(fan_in)), like nn.Linear default.
    """
    k1, k2, k3, k4 = jax.random.split(key, 4)
    bound1 = 1.0 / jnp.sqrt(2.0)   # fc1 fan_in = 2
    bound2 = 1.0 / jnp.sqrt(3.0)   # fc2 fan_in = 3
    w1 = jax.random.uniform(k1, (2, 3), jnp.float32, -bound1, bound1)
    b1 = jax.random.uniform(k2, (1, 3), jnp.float32, -bound1, bound1)
    w2 = jax.random.uniform(k3, (3, 1), jnp.float32, -bound2, bound2)
    b2 = jax.random.uniform(k4, (1, 1), jnp.float32, -bound2, bound2)
    return w1, b1, w2, b2


if __name__ == "__main__":
    key = jax.random.PRNGKey(0)
    kx, kp = jax.random.split(key)

    B = 8
    x = jax.random.normal(kx, (B, 2), jnp.float32)
    w1, b1, w2, b2 = init_params(kp)

    out = mlp_forward(x, w1, b1, w2, b2)
    out = jax.block_until_ready(out)

    # Reference check in plain JAX (same math as the PyTorch module).
    ref = jax.nn.sigmoid(jax.nn.sigmoid(x @ w1 + b1) @ w2 + b2)
    assert out.shape == (B, 1)
    assert jnp.allclose(out, ref, atol=1e-5), "mismatch vs reference"

    print("KERNEL_OK")
</pallas_src>

<mosaic_0001>
module attributes {stable_mosaic.version = 11 : i64} {
  func.func @mlp_kernel(%arg0: i32, %arg1: memref<13xf32, #tpu.memory_space<smem>>, %arg2: memref<2x128xf32, #tpu.memory_space<vmem>>, %arg3: memref<1x128xf32, #tpu.memory_space<vmem>>) attributes {dimension_semantics = [#tpu.dimension_semantics<parallel>], iteration_bounds = array<i64: 1>, scalar_prefetch = 0 : i64, scratch_operands = 0 : i64, tpu.core_type = #tpu.core_type<tc>, window_params = [{transform_indices = @transform_0, window_bounds = array<i64: 13>}, {transform_indices = @transform_1, window_bounds = array<i64: 2, 128>}, {transform_indices = @transform_2, window_bounds = array<i64: 1, 128>}]} {
    %c0 = arith.constant 0 : index
    %c0_0 = arith.constant 0 : index
    %0 = vector.load %arg2[%c0, %c0_0] : memref<2x128xf32, #tpu.memory_space<vmem>>, vector<1x128xf32>
    %c1 = arith.constant 1 : index
    %c0_1 = arith.constant 0 : index
    %1 = vector.load %arg2[%c1, %c0_1] : memref<2x128xf32, #tpu.memory_space<vmem>>, vector<1x128xf32>
    %c0_2 = arith.constant 0 : index
    %2 = memref.load %arg1[%c0_2] : memref<13xf32, #tpu.memory_space<smem>>
    %3 = vector.broadcast %2 : f32 to vector<1x128xf32>
    %4 = arith.mulf %0, %3 : vector<1x128xf32>
    %c3 = arith.constant 3 : index
    %5 = memref.load %arg1[%c3] : memref<13xf32, #tpu.memory_space<smem>>
    %6 = vector.broadcast %5 : f32 to vector<1x128xf32>
    %7 = arith.mulf %1, %6 : vector<1x128xf32>
    %8 = arith.addf %4, %7 : vector<1x128xf32>
    %c6 = arith.constant 6 : index
    %9 = memref.load %arg1[%c6] : memref<13xf32, #tpu.memory_space<smem>>
    %10 = vector.broadcast %9 : f32 to vector<1x128xf32>
    %11 = arith.addf %8, %10 : vector<1x128xf32>
    %12 = arith.negf %11 : vector<1x128xf32>
    %13 = math.exp %12 : vector<1x128xf32>
    %cst = arith.constant 1.000000e+00 : f32
    %14 = vector.broadcast %cst : f32 to vector<1x128xf32>
    %15 = arith.addf %14, %13 : vector<1x128xf32>
    %16 = arith.divf %14, %15 : vector<1x128xf32>
    %c1_3 = arith.constant 1 : index
    %17 = memref.load %arg1[%c1_3] : memref<13xf32, #tpu.memory_space<smem>>
    %18 = vector.broadcast %17 : f32 to vector<1x128xf32>
    %19 = arith.mulf %0, %18 : vector<1x128xf32>
    %c4 = arith.constant 4 : index
    %20 = memref.load %arg1[%c4] : memref<13xf32, #tpu.memory_space<smem>>
    %21 = vector.broadcast %20 : f32 to vector<1x128xf32>
    %22 = arith.mulf %1, %21 : vector<1x128xf32>
    %23 = arith.addf %19, %22 : vector<1x128xf32>
    %c7 = arith.constant 7 : index
    %24 = memref.load %arg1[%c7] : memref<13xf32, #tpu.memory_space<smem>>
    %25 = vector.broadcast %24 : f32 to vector<1x128xf32>
    %26 = arith.addf %23, %25 : vector<1x128xf32>
    %27 = arith.negf %26 : vector<1x128xf32>
    %28 = math.exp %27 : vector<1x128xf32>
    %cst_4 = arith.constant 1.000000e+00 : f32
    %29 = vector.broadcast %cst_4 : f32 to vector<1x128xf32>
    %30 = arith.addf %29, %28 : vector<1x128xf32>
    %31 = arith.divf %29, %30 : vector<1x128xf32>
    %c2 = arith.constant 2 : index
    %32 = memref.load %arg1[%c2] : memref<13xf32, #tpu.memory_space<smem>>
    %33 = vector.broadcast %32 : f32 to vector<1x128xf32>
    %34 = arith.mulf %0, %33 : vector<1x128xf32>
    %c5 = arith.constant 5 : index
    %35 = memref.load %arg1[%c5] : memref<13xf32, #tpu.memory_space<smem>>
    %36 = vector.broadcast %35 : f32 to vector<1x128xf32>
    %37 = arith.mulf %1, %36 : vector<1x128xf32>
    %38 = arith.addf %34, %37 : vector<1x128xf32>
    %c8 = arith.constant 8 : index
    %39 = memref.load %arg1[%c8] : memref<13xf32, #tpu.memory_space<smem>>
    %40 = vector.broadcast %39 : f32 to vector<1x128xf32>
    %41 = arith.addf %38, %40 : vector<1x128xf32>
    %42 = arith.negf %41 : vector<1x128xf32>
    %43 = math.exp %42 : vector<1x128xf32>
    %cst_5 = arith.constant 1.000000e+00 : f32
    %44 = vector.broadcast %cst_5 : f32 to vector<1x128xf32>
    %45 = arith.addf %44, %43 : vector<1x128xf32>
    %46 = arith.divf %44, %45 : vector<1x128xf32>
    %c9 = arith.constant 9 : index
    %47 = memref.load %arg1[%c9] : memref<13xf32, #tpu.memory_space<smem>>
    %48 = vector.broadcast %47 : f32 to vector<1x128xf32>
    %49 = arith.mulf %16, %48 : vector<1x128xf32>
    %c10 = arith.constant 10 : index
    %50 = memref.load %arg1[%c10] : memref<13xf32, #tpu.memory_space<smem>>
    %51 = vector.broadcast %50 : f32 to vector<1x128xf32>
    %52 = arith.mulf %31, %51 : vector<1x128xf32>
    %53 = arith.addf %49, %52 : vector<1x128xf32>
    %c11 = arith.constant 11 : index
    %54 = memref.load %arg1[%c11] : memref<13xf32, #tpu.memory_space<smem>>
    %55 = vector.broadcast %54 : f32 to vector<1x128xf32>
    %56 = arith.mulf %46, %55 : vector<1x128xf32>
    %57 = arith.addf %53, %56 : vector<1x128xf32>
    %c12 = arith.constant 12 : index
    %58 = memref.load %arg1[%c12] : memref<13xf32, #tpu.memory_space<smem>>
    %59 = vector.broadcast %58 : f32 to vector<1x128xf32>
    %60 = arith.addf %57, %59 : vector<1x128xf32>
    %61 = arith.negf %60 : vector<1x128xf32>
    %62 = math.exp %61 : vector<1x128xf32>
    %cst_6 = arith.constant 1.000000e+00 : f32
    %63 = vector.broadcast %cst_6 : f32 to vector<1x128xf32>
    %64 = arith.addf %63, %62 : vector<1x128xf32>
    %65 = arith.divf %63, %64 : vector<1x128xf32>
    %c0_7 = arith.constant 0 : index
    %c0_8 = arith.constant 0 : index
    %66 = vector.load %arg3[%c0_7, %c0_8] : memref<1x128xf32, #tpu.memory_space<vmem>>, vector<1x128xf32>
    tpu.vector_store %arg3[%c0_7, %c0_8], %65 {strides = array<i32>} : memref<1x128xf32, #tpu.memory_space<vmem>>, vector<1x128xf32>,
    return
  }
  func.func @transform_0(%arg0: i32) -> i32 {
    %c0_i32 = arith.constant 0 : i32
    %c0_i32_0 = arith.constant 0 : i32
    return %c0_i32 : i32
  }
  func.func @transform_1(%arg0: i32) -> (i32, i32) {
    %c0_i32 = arith.constant 0 : i32
    %c0_i32_0 = arith.constant 0 : i32
    return %c0_i32, %arg0 : i32, i32
  }
  func.func @transform_2(%arg0: i32) -> (i32, i32) {
    %c0_i32 = arith.constant 0 : i32
    %c0_i32_0 = arith.constant 0 : i32
    return %c0_i32, %arg0 : i32, i32
  }
}

</mosaic_0001>

<bundles_post_ra>
// kernel: tpu_custom_call.1
= control target key start
LH: loop header
LB: loop body
LE: loop exit
PB: predicated region body
PF: predicated region fallthrough
CT: control target
= control target key end

     0   :  { %7 = vsyncpa [#allocation5], 0  ;;  %s323_s0 = inlined_call_operand.hbm [shape: f32[13], index: 0, kind: input, shape index: {}]   ;;  %s324_s1 = inlined_call_operand.hbm [shape: f32[2,128], index: 1, kind: input, shape index: {}]   ;;  %s325_s2 = inlined_call_operand.hbm [shape: f32[1,128], index: 2, kind: output, shape index: {}]  }
   0x1   :  { %8 = vsyncpa [#allocation3], 0 }
   0x2   :  { %9 = vsyncpa [#allocation4], 0  ;;  %s15_s11 = sshll.u32 %s323_s0, 4  ;;  %s24_s14 = sshll.u32 %s324_s1, 4  ;;  %s16_s11 = int_to_ptr.hbm [resolvable:$true] %s15_s11  ;;  %s25_s14 = int_to_ptr.hbm [resolvable:$true] %s24_s14 }
   0x3   :  { %s281_s15 = smov [#allocation2]   ;;  %s282_s16 = smov [#allocation6]  }
   0x4   :  { %18 = dma.hbm_to_smem %s16_s11, 16, %s281_s15, [#allocation5]  }
   0x5   :  { %s26_s17 = sshll.u32 %s282_s16, 4  ;;  %s27_s17 = int_to_ptr.vmem [resolvable:$true] %s26_s17 }
   0x6   :  { %29 = dma.hbm_to_vmem [thread:$0]  %s25_s14, 32, %s27_s17, [#allocation3]  }
   0x7   :  { %275 = dma.done.wait [#allocation5], 16  }
   0x8   :  { %276 = vsyncadd [#allocation5], 4294967280 }
   0x9   :  { %277 = dma.done.wait [#allocation3], 32  }
   0xa   :  { %278 = vsyncadd [#allocation3], 4294967264 }
   0xb   :  { %38 = sfence }
   0xc   :  { %s41_s18 = sld [smem:[#allocation2]]  ;;  %v39_v0 = vld [vmem:[#allocation6] sm:$0x1]  ;;  %v40_v1 = vld [vmem:[#allocation6 + $0x1] sm:$0x1]  ;;  %s283_s29 = smov [#allocation7]  }
   0xd   :  { %s180_s19 = sld [smem:[#allocation2 + $0x3]]  ;;  %s167_s30 = sshll.u32 %s283_s29, 4  ;;  %s168_s30 = int_to_ptr.vmem [resolvable:$true] %s167_s30 }
   0xe   :  { %s181_s0 = sld [smem:[#allocation2 + $0x6]]  ;;  %s169_s5 = sshll.u32 %s325_s2, 4  ;;  %s170_s5 = int_to_ptr.hbm [resolvable:$true] %s169_s5 }
   0xf   :  { %s183_s20 = sld [smem:[#allocation2 + $0x1]] }
  0x10   :  { %s184_s21 = sld [smem:[#allocation2 + $0x4]] }
  0x11   :  { %s185_s1 = sld [smem:[#allocation2 + $0x7]] }
  0x12   :  { %v42_v2 = vstv %s41_s18  ;;  %s187_s22 = sld [smem:[#allocation2 + $0x2]] }
  0x13   :  { %v43_v3 = vmul.f32 %v42_v2, %v39_v0  ;;  %v45_v4 = vstv %s180_s19  ;;  %s188_s23 = sld [smem:[#allocation2 + $0x5]] }
  0x14   :  { %v46_v5 = vmul.f32 %v45_v4, %v40_v1  ;;  %s189_s24 = sld [smem:[#allocation2 + $0x8]]  ;;  %v49_v6 = vstv %s181_s0 }
  0x15   :  { %v71_v7 = vstv %s183_s20  ;;  %s305_s25 = sld [smem:[#allocation2 + $0x9]] }
  0x16   :  { %v47_v8 = vadd.f32 %v46_v5, %v43_v3  ;;  %v72_v9 = vmul.f32 %v71_v7, %v39_v0  ;;  %v74_v10 = vstv %s184_s21  ;;  %s307_s26 = sld [smem:[#allocation2 + $0xa]] }
  0x17   :  { %v75_v11 = vmul.f32 %v74_v10, %v40_v1  ;;  %v78_v13 = vstv %s185_s1  ;;  %s313_s27 = sld [smem:[#allocation2 + $0xb]] }
  0x18   :  { %v50_v12 = vadd.f32 %v49_v6, %v47_v8  ;;  %v100_v14 = vstv %s187_s22  ;;  %s194_s28 = sld [smem:[#allocation2 + $0xc]] }
  0x19   :  { %v76_v15 = vadd.f32 %v75_v11, %v72_v9  ;;  %v101_v16 = vmul.f32 %v100_v14, %v39_v0  ;;  %v103_v17 = vstv %s188_s23 }
  0x1a   :  { %v182_v18 = vmul.f32 -1.442695, %v50_v12  ;;  %v104_v19 = vmul.f32 %v103_v17, %v40_v1  ;;  %v107_v21 = vstv %s189_s24 }
  0x1b   :  { %v79_v20 = vadd.f32 %v78_v13, %v76_v15  ;;  %v129_v48 = vstv %s305_s25 }
  0x1c   :  { %199 = vpow2.f32 %v182_v18  ;;  %v105_v22 = vadd.f32 %v104_v19, %v101_v16  ;;  %v132_v58 = vstv %s307_s26 }
  0x1d   :  { %v186_v23 = vmul.f32 -1.442695, %v79_v20  ;;  %v136_v1 = vstv %s313_s27 }
  0x1e   :  { %v108_v24 = vadd.f32 %v107_v21, %v105_v22  ;;  %v140_v6 = vstv %s194_s28 }
  0x1f   :  { %201 = vpow2.f32 %v186_v23 }
  0x20   :  { %v190_v25 = vmul.f32 -1.442695, %v108_v24 }
  0x22   :  { %v200_v26 = vpop.eup %199  ;;  %203 = vpow2.f32 %v190_v25 }
  0x23   :  { %v54_v27 = vadd.f32 1.0, %v200_v26 }
  0x25   :  { %v202_v28 = vpop.eup %201  ;;  %205 = vrcp.f32 %v54_v27  ;;  %v66_v34 = vand.u32 2147483648, %v54_v27  ;;  %vm60_vm0 = vweird.f32 %v54_v27  ;;  %v64_v37 = vand.u32 2147483647, %v54_v27 }
  0x26   :  { %v83_v29 = vadd.f32 1.0, %v202_v28 }
  0x27   :  { %v67_v41 = vor.u32 1.1754944e-38, %v66_v34  ;;  %vm65_vm5 = vcmp.eq.f32.partialorder %v64_v37, 8.507059e+37 }
  0x28   :  { %v204_v30 = vpop.eup %203  ;;  %207 = vrcp.f32 %v83_v29  ;;  %v95_v39 = vand.u32 2147483648, %v83_v29  ;;  %vm89_vm3 = vweird.f32 %v83_v29  ;;  %v93_v45 = vand.u32 2147483647, %v83_v29 }
  0x29   :  { %v112_v31 = vadd.f32 1.0, %v204_v30 }
  0x2a   :  { %v96_v50 = vor.u32 1.1754944e-38, %v95_v39  ;;  %vm94_vm9 = vcmp.eq.f32.partialorder %v93_v45, 8.507059e+37 }
  0x2b   :  { %v206_v32 = vpop.eup %205  ;;  %209 = vrcp.f32 %v112_v31  ;;  %vm118_vm6 = vweird.f32 %v112_v31  ;;  %v124_v51 = vand.u32 2147483648, %v112_v31  ;;  %v122_v54 = vand.u32 2147483647, %v112_v31 }
  0x2c   :  { %v56_v33 = vmul.f32 %v206_v32, %v54_v27  ;;  %vm61_vm1 = vweird.f32 %v206_v32 }
  0x2d   :  { %vm309_vm2 = vmor %vm60_vm0, %vm61_vm1  ;;  %v125_v60 = vor.u32 1.1754944e-38, %v124_v51  ;;  %vm123_vm11 = vcmp.eq.f32.partialorder %v122_v54, 8.507059e+37 }
  0x2e   :  { %v208_v35 = vpop.eup %207  ;;  %v57_v36 = vsub.f32 1.0, %v56_v33 }
  0x2f   :  { %v85_v38 = vmul.f32 %v208_v35, %v83_v29  ;;  %vm90_vm4 = vweird.f32 %v208_v35 }
  0x30   :  { %v58_v40 = vmul.f32 %v206_v32, %v57_v36  ;;  %vm91_vm7 = vmor %vm89_vm3, %vm90_vm4 }
  0x31   :  { %v210_v42 = vpop.eup %209  ;;  %v86_v44 = vsub.f32 1.0, %v85_v38 }
  0x32   :  { %v59_v46 = vadd.f32 %v206_v32, %v58_v40  ;;  %v114_v47 = vmul.f32 %v210_v42, %v112_v31  ;;  %vm119_vm8 = vweird.f32 %v210_v42 }
  0x33   :  { %v87_v49 = vmul.f32 %v208_v35, %v86_v44  ;;  %vm120_vm10 = vmor %vm118_vm6, %vm119_vm8 }
  0x34   :  { %v63_v52 = vsel %vm309_vm2, %v206_v32, %v59_v46  ;;  %v115_v53 = vsub.f32 1.0, %v114_v47 }
  0x35   :  { %v68_v55 = vsel %vm65_vm5, %v67_v41, %v63_v52  ;;  %v88_v56 = vadd.f32 %v208_v35, %v87_v49 }
  0x36   :  { %v116_v57 = vmul.f32 %v210_v42, %v115_v53  ;;  %v130_v61 = vmul.f32 %v129_v48, %v68_v55 }
  0x37   :  { %v92_v59 = vsel %vm91_vm7, %v208_v35, %v88_v56 }
  0x38   :  { %v97_v62 = vsel %vm94_vm9, %v96_v50, %v92_v59  ;;  %v117_v63 = vadd.f32 %v210_v42, %v116_v57 }
  0x39   :  { %v133_v0 = vmul.f32 %v132_v58, %v97_v62 }
  0x3a   :  { %v121_v2 = vsel %vm120_vm10, %v210_v42, %v117_v63 }
  0x3b   :  { %v126_v3 = vsel %vm123_vm11, %v125_v60, %v121_v2  ;;  %v134_v4 = vadd.f32 %v133_v0, %v130_v61 }
  0x3c   :  { %v137_v5 = vmul.f32 %v136_v1, %v126_v3 }
  0x3e   :  { %v138_v7 = vadd.f32 %v137_v5, %v134_v4 }
  0x40   :  { %v141_v8 = vadd.f32 %v140_v6, %v138_v7 }
  0x42   :  { %v195_v9 = vmul.f32 -1.442695, %v141_v8 }
  0x44   :  { %211 = vpow2.f32 %v195_v9 }
  0x4a   :  { %v212_v10 = vpop.eup %211 }
  0x4b   :  { %v145_v11 = vadd.f32 1.0, %v212_v10 }
  0x4d   :  { %213 = vrcp.f32 %v145_v11  ;;  %v157_v14 = vand.u32 2147483648, %v145_v11  ;;  %vm151_vm12 = vweird.f32 %v145_v11  ;;  %v155_v16 = vand.u32 2147483647, %v145_v11 }
  0x4f   :  { %v158_v18 = vor.u32 1.1754944e-38, %v157_v14  ;;  %vm156_vm15 = vcmp.eq.f32.partialorder %v155_v16, 8.507059e+37 }
  0x53   :  { %v214_v12 = vpop.eup %213 }
  0x54   :  { %v147_v13 = vmul.f32 %v214_v12, %v145_v11  ;;  %vm152_vm13 = vweird.f32 %v214_v12 }
  0x55   :  { %vm153_vm14 = vmor %vm151_vm12, %vm152_vm13 }
  0x56   :  { %v148_v15 = vsub.f32 1.0, %v147_v13 }
  0x58   :  { %v149_v17 = vmul.f32 %v214_v12, %v148_v15 }
  0x5a   :  { %v150_v19 = vadd.f32 %v214_v12, %v149_v17 }
  0x5c   :  { %v154_v20 = vsel %vm153_vm14, %v214_v12, %v150_v19 }
  0x5d   :  { %v159_v21 = vsel %vm156_vm15, %v158_v18, %v154_v20 }
  0x5e   :  { %161 = vst [vmem:[#allocation7] sm:$0x1] %v159_v21 }
  0x5f   :  { %172 = dma.vmem_to_hbm [thread:$0]  %s168_s30, 16, %s170_s5, [#allocation4]  }
  0x60   :  { %279 = dma.done.wait [#allocation4], 16  }
  0x61   :  { %280 = vsyncadd [#allocation4], 4294967280 }
  0x62   :  { %177 = vsyncpa [#allocation3], 1 }
  0x63   :  { %178 = vsyncpa [#allocation4], 1 }
  0x64   :  { %179 = vsyncpa [#allocation5], 1 }

</bundles_post_ra>
